<compile_context>
chip_gen: v6e
topology: v6e:2x2x1
jax: 0.10.0
libtpu: 0.0.40
codegen_flags: <defaults>
</compile_context>

<pallas_src>
import jax
import jax.numpy as jnp
from jax.experimental import pallas as pl
from jax.experimental.pallas import tpu as pltpu


def _identity_kernel(x_ref, o_ref):
    # TODO(synk): BasePostProcessor.forward raises NotImplementedError in
    # PyTorch; identity pass-through is the only well-defined base semantics.
    # Subclasses add their per-tile compute between the load and the store.
    o_ref[...] = x_ref[...]


# ~2 MiB blocks: measured mem-bound tiling plateaus at ~85% of HBM roofline
# around 1–4 MiB; small blocks keep >=8 grid steps on real renders so the
# software pipeline hides the first-read / last-write DMAs.
_TARGET_BLOCK_BYTES = 2 << 20


def _sublane_tile(dtype) -> int:
    """Native packed sublane tile: 8 (f32), 16 (bf16/f16), 32 (int8/fp8)."""
    itemsize = jnp.dtype(dtype).itemsize
    return max(8, 32 // max(1, itemsize))


def _choose_tiling(rows: int, h: int, w: int, dtype):
    """Pick (block_rows, block_h) for a (rows, h, w) view.

    The last dim is always the full `w`; `block_h` is either full `h` or a
    multiple of the dtype's sublane tile, so the BlockSpec's (8,128) rule is
    always satisfied without any lane-regrouping reshape.
    """
    itemsize = jnp.dtype(dtype).itemsize
    sub = _sublane_tile(dtype)
    slice_bytes = h * w * itemsize
    total_bytes = rows * slice_bytes

    # Small input: one block, one grid step.
    if total_bytes <= _TARGET_BLOCK_BYTES:
        return rows, h

    if slice_bytes <= _TARGET_BLOCK_BYTES:
        # Tile over the collapsed leading (N*C) axis; whole (H, W) slices/block.
        bn = max(1, _TARGET_BLOCK_BYTES // slice_bytes)
        bn = min(bn, rows)
        steps = pl.cdiv(rows, bn)
        if steps > 1 and steps % 2:
            # Nudge to an even step count so both v7x TensorCores stay busy.
            for delta in range(1, rows):
                found = False
                for cand in (bn - delta, bn + delta):
                    if 1 <= cand <= rows and pl.cdiv(rows, cand) % 2 == 0:
                        bn = cand
                        found = True
                        break
                if found:
                    break
        return bn, h

    # A single (H, W) slice exceeds the target: tile H inside the slice,
    # aligned to the dtype sublane tile so stores stay unmasked full vregs.
    row_bytes = w * itemsize
    if h % 8 == 0:
        align = sub if h % sub == 0 else 8
        bh = max(align, (_TARGET_BLOCK_BYTES // max(1, row_bytes)) // align * align)
        bh = min(bh, h)
    else:
        bh = h  # non-8-aligned H: keep the full extent (BlockSpec rule)
    return 1, bh


class BasePostProcessorPallas:
    """JAX/Pallas analogue of the abstract BasePostProcessor."""

    def __init__(self):
        self.config = {"class": type(self).__name__}
        # torch.nn.Parameter(torch.empty(0)) -> empty float32 array (unused).
        self.device_tracker = jnp.zeros((0,), dtype=jnp.float32)
        self.is_trainable = False
        self.training_ = False

    def get_callbacks(self):
        return []

    def draw_ui(self):
        pass

    def __call__(self, render: jnp.ndarray, render_info=None) -> jnp.ndarray:
        """Identity pass-through of the render (NCHW) via a tiled Pallas copy.

        Note: the strict base-class identity could simply `return render`
        (zero HBM traffic); the tiled kernel below is the template subclasses
        fill with per-tile compute.
        """
        n, c, h, w = render.shape
        rows = n * c
        # Layout-preserving collapse of the leading dims only: the last two
        # (tiled) dims are unchanged, so this is a bitcast, not an HBM relayout.
        x3 = render.reshape(rows, h, w)

        bn, bh = _choose_tiling(rows, h, w, render.dtype)
        grid = (pl.cdiv(rows, bn), pl.cdiv(h, bh))
        itemsize = jnp.dtype(render.dtype).itemsize

        out = pl.pallas_call(
            _identity_kernel,
            out_shape=jax.ShapeDtypeStruct((rows, h, w), render.dtype),
            grid_spec=pltpu.PrefetchScalarGridSpec(
                num_scalar_prefetch=0,
                grid=grid,
                in_specs=[pl.BlockSpec((bn, bh, w), lambda i, j: (i, j, 0))],
                out_specs=pl.BlockSpec((bn, bh, w), lambda i, j: (i, j, 0)),
            ),
            compiler_params=pltpu.CompilerParams(
                # Independent tiles: both grid axes shard across v7x's 2 TCs.
                dimension_semantics=("parallel", "parallel"),
                # No vmem_limit override: <=2 MiB blocks x 4 buffers fit every
                # generation's scoped default (16/32 MiB) with headroom.
            ),
            cost_estimate=pl.CostEstimate(
                flops=0,
                transcendentals=0,
                bytes_accessed=2 * rows * h * w * itemsize,
            ),
        )(x3)

        return out.reshape(n, c, h, w)


if __name__ == "__main__":
    key = jax.random.PRNGKey(0)
    # Small "render" image: batch=2, channels=4, spatial=16x16 (NCHW).
    x = jax.random.normal(key, (2, 4, 16, 16), dtype=jnp.float32)

    post = BasePostProcessorPallas()
    y = post(x)
    y = jax.block_until_ready(y)

    assert y.shape == x.shape
    assert y.dtype == x.dtype
    assert bool(jnp.all(y == x)), "identity pass-through mismatch"

    print("KERNEL_OK")
</pallas_src>

<mosaic_0001>
module attributes {stable_mosaic.version = 11 : i64} {
  func.func @_identity_kernel(%arg0: i32, %arg1: i32, %arg2: memref<8x16x16xf32, #tpu.memory_space<vmem>>, %arg3: memref<8x16x16xf32, #tpu.memory_space<vmem>>) attributes {dimension_semantics = [#tpu.dimension_semantics<parallel>, #tpu.dimension_semantics<parallel>], iteration_bounds = array<i64: 1, 1>, scalar_prefetch = 0 : i64, scratch_operands = 0 : i64, tpu.core_type = #tpu.core_type<tc>, window_params = [{transform_indices = @transform_0, window_bounds = array<i64: 8, 16, 16>}, {transform_indices = @transform_1, window_bounds = array<i64: 8, 16, 16>}]} {
    %c0 = arith.constant 0 : index
    %c0_0 = arith.constant 0 : index
    %c0_1 = arith.constant 0 : index
    %0 = vector.load %arg2[%c0, %c0_0, %c0_1] : memref<8x16x16xf32, #tpu.memory_space<vmem>>, vector<8x16x16xf32>
    %c0_2 = arith.constant 0 : index
    %c0_3 = arith.constant 0 : index
    %c0_4 = arith.constant 0 : index
    %1 = vector.load %arg3[%c0_2, %c0_3, %c0_4] : memref<8x16x16xf32, #tpu.memory_space<vmem>>, vector<8x16x16xf32>
    tpu.vector_store %arg3[%c0_2, %c0_3, %c0_4], %0 {strides = array<i32>} : memref<8x16x16xf32, #tpu.memory_space<vmem>>, vector<8x16x16xf32>,
    return
  }
  func.func @transform_0(%arg0: i32, %arg1: i32) -> (i32, i32, i32) {
    %c0_i32 = arith.constant 0 : i32
    %c0_i32_0 = arith.constant 0 : i32
    return %arg0, %arg1, %c0_i32 : i32, i32, i32
  }
  func.func @transform_1(%arg0: i32, %arg1: i32) -> (i32, i32, i32) {
    %c0_i32 = arith.constant 0 : i32
    %c0_i32_0 = arith.constant 0 : i32
    return %arg0, %arg1, %c0_i32 : i32, i32, i32
  }
}

</mosaic_0001>

<bundles_post_ra>
// kernel: tpu_custom_call.1
= control target key start
LH: loop header
LB: loop body
LE: loop exit
PB: predicated region body
PF: predicated region fallthrough
CT: control target
= control target key end

     0   :  { %6 = vsyncpa [#allocation3], 0  ;;  %s163_s0 = inlined_call_operand.hbm [shape: f32[8,16,16], index: 0, kind: input, shape index: {}]   ;;  %s164_s1 = inlined_call_operand.hbm [shape: f32[8,16,16], index: 1, kind: output, shape index: {}]  }
   0x1   :  { %7 = vsyncpa [#allocation4], 0  ;;  %s121_s6 = smov [#allocation2]  }
   0x2   :  { %s13_s7 = sshll.u32 %s121_s6, 4  ;;  %s14_s7 = int_to_ptr.vmem [resolvable:$true] %s13_s7 }
   0x3   :  { %s85_s8 = scalar_lea.vmem %s14_s7, 2048  ;;  %p90_p1 = scmp.lt.s32.totalorder %s14_s7, %s14_s7 }
   0x4   :  { %p86_p0 = scmp.ne.s32.totalorder %s14_s7, %s85_s8  ;;  %p91_p2 = scmp.lt.s32.totalorder %s85_s8, %s85_s8 }
   0x6   :  { %p92_p3 = por %p91_p2, %p90_p1 }
   0x8   :  { %p93_p4 = pnand %p92_p3, %p86_p0 }
   0xa   :  { %96 = shalt.err (!%p93_p4)
}
   0xb   :  { %s122_s9 = smov 128   ;;  %s123_s10 = smov 8  }
   0xc   :  { %19 = dma.hbm_to_vmem [thread:$0]  %s163_s0, 2048, %s14_s7, [#allocation3], %s122_s9, %s122_s9, %s123_s10  }
   0xd   :  { %117 = dma.done.wait [#allocation3], 2048  }
   0xe   :  { %118 = vsyncadd [#allocation3], 4294965248  ;;  %vm39_vm0 = vcmask 130048   ;;  %v23_v0 = vld [vmem:[#allocation2] sm:$0xff]  ;;  %v24_v1 = vld [vmem:[#allocation2 + $0x8] sm:$0xff]  ;;  %s124_s13 = smov [#allocation5]  }
   0xf   :  { %v25_v2 = vld [vmem:[#allocation2 + $0x10] sm:$0xff]  ;;  %40 = vst.msk [vmem:[#allocation5] sm:$0xff] %vm39_vm0, %v23_v0  ;;  %41 = vst.msk [vmem:[#allocation5 + $0x8] sm:$0xff] %vm39_vm0, %v24_v1  ;;  %v26_v3 = vld [vmem:[#allocation2 + $0x18] sm:$0xff]  ;;  %s61_s14 = sshll.u32 %s124_s13, 4  ;;  %s62_s14 = int_to_ptr.vmem [resolvable:$true] %s61_s14 }
  0x10   :  { %42 = vst.msk [vmem:[#allocation5 + $0x10] sm:$0xff] %vm39_vm0, %v25_v2  ;;  %v27_v4 = vld [vmem:[#allocation2 + $0x20] sm:$0xff]  ;;  %v28_v5 = vld [vmem:[#allocation2 + $0x28] sm:$0xff]  ;;  %43 = vst.msk [vmem:[#allocation5 + $0x18] sm:$0xff] %vm39_vm0, %v26_v3  ;;  %s97_s0 = scalar_lea.vmem %s62_s14, 2048  ;;  %p102_p6 = scmp.lt.s32.totalorder %s62_s14, %s62_s14 }
  0x11   :  { %44 = vst.msk [vmem:[#allocation5 + $0x20] sm:$0xff] %vm39_vm0, %v27_v4  ;;  %45 = vst.msk [vmem:[#allocation5 + $0x28] sm:$0xff] %vm39_vm0, %v28_v5  ;;  %v29_v6 = vld [vmem:[#allocation2 + $0x30] sm:$0xff]  ;;  %v30_v7 = vld [vmem:[#allocation2 + $0x38] sm:$0xff]  ;;  %p98_p5 = scmp.ne.s32.totalorder %s62_s14, %s97_s0  ;;  %p103_p7 = scmp.lt.s32.totalorder %s97_s0, %s97_s0 }
  0x12   :  { %v31_v8 = vld [vmem:[#allocation2 + $0x40] sm:$0xff]  ;;  %46 = vst.msk [vmem:[#allocation5 + $0x30] sm:$0xff] %vm39_vm0, %v29_v6  ;;  %47 = vst.msk [vmem:[#allocation5 + $0x38] sm:$0xff] %vm39_vm0, %v30_v7  ;;  %v32_v9 = vld [vmem:[#allocation2 + $0x48] sm:$0xff] }
  0x13   :  { %48 = vst.msk [vmem:[#allocation5 + $0x40] sm:$0xff] %vm39_vm0, %v31_v8  ;;  %v33_v10 = vld [vmem:[#allocation2 + $0x50] sm:$0xff]  ;;  %v34_v11 = vld [vmem:[#allocation2 + $0x58] sm:$0xff]  ;;  %49 = vst.msk [vmem:[#allocation5 + $0x48] sm:$0xff] %vm39_vm0, %v32_v9  ;;  %p104_p8 = por %p103_p7, %p102_p6 }
  0x14   :  { %50 = vst.msk [vmem:[#allocation5 + $0x50] sm:$0xff] %vm39_vm0, %v33_v10  ;;  %51 = vst.msk [vmem:[#allocation5 + $0x58] sm:$0xff] %vm39_vm0, %v34_v11  ;;  %v35_v12 = vld [vmem:[#allocation2 + $0x60] sm:$0xff]  ;;  %v36_v13 = vld [vmem:[#allocation2 + $0x68] sm:$0xff] }
  0x15   :  { %v37_v14 = vld [vmem:[#allocation2 + $0x70] sm:$0xff]  ;;  %52 = vst.msk [vmem:[#allocation5 + $0x60] sm:$0xff] %vm39_vm0, %v35_v12  ;;  %53 = vst.msk [vmem:[#allocation5 + $0x68] sm:$0xff] %vm39_vm0, %v36_v13  ;;  %v38_v15 = vld [vmem:[#allocation2 + $0x78] sm:$0xff]  ;;  %p105_p9 = pnand %p104_p8, %p98_p5 }
  0x16   :  { %54 = vst.msk [vmem:[#allocation5 + $0x70] sm:$0xff] %vm39_vm0, %v37_v14  ;;  %55 = vst.msk [vmem:[#allocation5 + $0x78] sm:$0xff] %vm39_vm0, %v38_v15 }
  0x17   :  { %108 = shalt.err (!%p105_p9)
}
  0x18   :  { %67 = dma.vmem_to_hbm [thread:$0]  %s62_s14, 2048, %s164_s1, [#allocation4], %s122_s9, %s122_s9, %s123_s10  }
  0x19   :  { %119 = dma.done.wait [#allocation4], 2048  }
  0x1a   :  { %120 = vsyncadd [#allocation4], 4294965248 }
  0x1b   :  { %71 = vsyncpa [#allocation3], 1 }
  0x1c   :  { %72 = vsyncpa [#allocation4], 1 }

</bundles_post_ra>
